<compile_context>
chip_gen: v6e
topology: v6e:2x2x1
jax: 0.10.0
libtpu: 0.0.40
codegen_flags: <defaults>
</compile_context>

<pallas_src>
import jax
import jax.numpy as jnp
import numpy as np
from jax.experimental import pallas as pl
from jax.experimental.pallas import tpu as pltpu

# ---------------- sizes ----------------
B = 8              # batch
IMG = 784          # 1 * 28 * 28
HID = 200          # fc_1 / fc_2 width
NCLS = 10          # classes

# lane-padded sizes (multiples of 128 on the lane axis)
IMG_P = 896        # 7 * 128
HID_P = 256        # 2 * 128
OUT_P = 256        # padded class lanes; sliced back to 10 in the wrapper

# Fashion-MNIST normalization constants (constants.FASHIONMNIST_MEAN / _STD)
FMNIST_MEAN = 0.2860
FMNIST_STD = 0.3530

# row offsets of each weight matrix inside the packed weight slab
_W1_OFF = 0
_W2_OFF = IMG_P
_W3_OFF = IMG_P + HID_P
_W_ROWS = IMG_P + 2 * HID_P        # 1408 rows x 256 lanes (bf16)
_B_ROWS = 24                       # f32 bias slab; rows 0 / 8 / 16 hold b1/b2/b3


# ---------------- Pallas kernel ----------------
def _classifier_e_kernel(x_ref, w_ref, b_ref, out_ref):
    f32 = jnp.float32

    # normalize(x): (x - mean) / std.  Padded input lanes (784:896) hold junk
    # after this, but the matching rows of w1 are zero, so they contribute 0.
    xn = (x_ref[...] - FMNIST_MEAN) * (1.0 / FMNIST_STD)

    # static slices into the packed slabs (no runtime cost)
    w1 = w_ref[_W1_OFF:_W1_OFF + IMG_P, :]
    w2 = w_ref[_W2_OFF:_W2_OFF + HID_P, :]
    w3 = w_ref[_W3_OFF:_W3_OFF + HID_P, :]
    b1 = b_ref[0:1, :]
    b2 = b_ref[8:9, :]
    b3 = b_ref[16:17, :]

    h1 = jnp.maximum(
        jnp.dot(xn.astype(jnp.bfloat16), w1, preferred_element_type=f32) + b1, 0.0)
    h2 = jnp.maximum(
        jnp.dot(h1.astype(jnp.bfloat16), w2, preferred_element_type=f32) + b2, 0.0)
    out_ref[...] = (
        jnp.dot(h2.astype(jnp.bfloat16), w3, preferred_element_type=f32) + b3)


# ---------------- wrapper ----------------
def classifier_e_forward(x_nchw, w_packed, b_packed):
    """x_nchw: (N, 1, 28, 28) f32 -> logits (N, 10) f32."""
    n = x_nchw.shape[0]
    x_flat = x_nchw.reshape(n, IMG).astype(jnp.float32)       # x.view(N, -1)
    x_pad = jnp.zeros((n, IMG_P), jnp.float32).at[:, :IMG].set(x_flat)

    flops = 2 * n * (IMG_P * HID_P + HID_P * HID_P + HID_P * OUT_P)
    bytes_accessed = (x_pad.size * 4 + w_packed.size * 2 +
                      b_packed.size * 4 + n * OUT_P * 4)

    vmem = pl.BlockSpec(memory_space=pltpu.MemorySpace.VMEM)
    out = pl.pallas_call(
        _classifier_e_kernel,
        out_shape=jax.ShapeDtypeStruct((n, OUT_P), jnp.float32),
        in_specs=[vmem, vmem, vmem],
        out_specs=vmem,
        cost_estimate=pl.CostEstimate(
            flops=flops, transcendentals=0, bytes_accessed=bytes_accessed),
    )(x_pad, w_packed, b_packed)
    return out[:, :NCLS]


# ---------------- parameter init + packing (plain-JAX glue) ----------------
def _linear_init(key, fan_in, fan_out):
    """Matches torch.nn.Linear default: U(-1/sqrt(fan_in), 1/sqrt(fan_in))."""
    kw, kb = jax.random.split(key)
    bound = 1.0 / np.sqrt(fan_in)
    w = jax.random.uniform(kw, (fan_in, fan_out), jnp.float32, -bound, bound)
    b = jax.random.uniform(kb, (fan_out,), jnp.float32, -bound, bound)
    return w, b


def make_classifier_e_params(key):
    k1, k2, k3 = jax.random.split(key, 3)
    w1, b1 = _linear_init(k1, IMG, HID)
    w2, b2 = _linear_init(k2, HID, HID)
    w3, b3 = _linear_init(k3, HID, NCLS)
    return (w1, b1, w2, b2, w3, b3)


def pack_params(w1, b1, w2, b2, w3, b3):
    """Pack all weights into one zero-padded bf16 slab and biases into one f32 slab."""
    w = jnp.zeros((_W_ROWS, HID_P), jnp.float32)
    w = w.at[_W1_OFF:_W1_OFF + IMG, :HID].set(w1)
    w = w.at[_W2_OFF:_W2_OFF + HID, :HID].set(w2)
    w = w.at[_W3_OFF:_W3_OFF + HID, :NCLS].set(w3)
    b = jnp.zeros((_B_ROWS, HID_P), jnp.float32)
    b = b.at[0, :HID].set(b1)
    b = b.at[8, :HID].set(b2)
    b = b.at[16, :NCLS].set(b3)
    return w.astype(jnp.bfloat16), b


if __name__ == "__main__":
    key = jax.random.PRNGKey(0)
    k_x, k_p = jax.random.split(key)

    # example input: NCHW (B, 1, 28, 28) image batch
    x = jax.random.uniform(k_x, (B, 1, 28, 28), jnp.float32)

    params = make_classifier_e_params(k_p)
    w_packed, b_packed = pack_params(*params)

    logits = classifier_e_forward(x, w_packed, b_packed)
    jax.block_until_ready(logits)

    # pure-JAX f32 reference (kernel uses bf16 weights -> loose tolerance)
    w1, b1, w2, b2, w3, b3 = params
    xr = (x.reshape(B, IMG) - FMNIST_MEAN) / FMNIST_STD
    h1 = jnp.maximum(xr @ w1 + b1, 0.0)
    h2 = jnp.maximum(h1 @ w2 + b2, 0.0)
    ref = h2 @ w3 + b3

    assert logits.shape == (B, NCLS) and logits.dtype == jnp.float32
    assert float(jnp.max(jnp.abs(logits - ref))) < 0.1
    print("KERNEL_OK")
</pallas_src>

<mosaic_0001>
module attributes {stable_mosaic.version = 11 : i64} {
  func.func @_classifier_e_kernel(%arg0: memref<8x896xf32, #tpu.memory_space<vmem>>, %arg1: memref<1408x256xbf16, #tpu.memory_space<vmem>>, %arg2: memref<24x256xf32, #tpu.memory_space<vmem>>, %arg3: memref<8x256xf32, #tpu.memory_space<vmem>>) attributes {dimension_semantics = [], scalar_prefetch = 0 : i64, scratch_operands = 0 : i64, tpu.core_type = #tpu.core_type<tc>} {
    %c0 = arith.constant 0 : index
    %c0_0 = arith.constant 0 : index
    %0 = vector.load %arg0[%c0, %c0_0] : memref<8x896xf32, #tpu.memory_space<vmem>>, vector<8x896xf32>
    %cst = arith.constant 2.860000e-01 : f32
    %1 = vector.broadcast %cst : f32 to vector<8x896xf32>
    %2 = arith.subf %0, %1 : vector<8x896xf32>
    %cst_1 = arith.constant 2.83286119 : f32
    %3 = vector.broadcast %cst_1 : f32 to vector<8x896xf32>
    %4 = arith.mulf %2, %3 : vector<8x896xf32>
    %c0_2 = arith.constant 0 : index
    %c0_3 = arith.constant 0 : index
    %5 = vector.load %arg1[%c0_2, %c0_3] : memref<1408x256xbf16, #tpu.memory_space<vmem>>, vector<896x256xbf16>
    %c896 = arith.constant 896 : index
    %c0_4 = arith.constant 0 : index
    %6 = vector.load %arg1[%c896, %c0_4] : memref<1408x256xbf16, #tpu.memory_space<vmem>>, vector<256x256xbf16>
    %c1152 = arith.constant 1152 : index
    %c0_5 = arith.constant 0 : index
    %7 = vector.load %arg1[%c1152, %c0_5] : memref<1408x256xbf16, #tpu.memory_space<vmem>>, vector<256x256xbf16>
    %c0_6 = arith.constant 0 : index
    %c0_7 = arith.constant 0 : index
    %8 = vector.load %arg2[%c0_6, %c0_7] : memref<24x256xf32, #tpu.memory_space<vmem>>, vector<1x256xf32>
    %c8 = arith.constant 8 : index
    %c0_8 = arith.constant 0 : index
    %9 = vector.load %arg2[%c8, %c0_8] : memref<24x256xf32, #tpu.memory_space<vmem>>, vector<1x256xf32>
    %c16 = arith.constant 16 : index
    %c0_9 = arith.constant 0 : index
    %10 = vector.load %arg2[%c16, %c0_9] : memref<24x256xf32, #tpu.memory_space<vmem>>, vector<1x256xf32>
    %11 = arith.truncf %4 : vector<8x896xf32> to vector<8x896xbf16>
    %cst_10 = arith.constant dense<0.000000e+00> : vector<8x256xf32>
    %12 = tpu.matmul %11, %5, %cst_10 {dimension_numbers = #tpu.dot_dimension_numbers<[1], [0], [0], [1], [0, 0, 1, 1], [], []>} : vector<8x896xbf16>, vector<896x256xbf16>, vector<8x256xf32> -> vector<8x256xf32>
    %13 = vector.broadcast %8 : vector<1x256xf32> to vector<8x256xf32>
    %14 = arith.addf %12, %13 : vector<8x256xf32>
    %cst_11 = arith.constant 0.000000e+00 : f32
    %15 = vector.broadcast %cst_11 : f32 to vector<8x256xf32>
    %16 = arith.maximumf %14, %15 : vector<8x256xf32>
    %17 = arith.truncf %16 : vector<8x256xf32> to vector<8x256xbf16>
    %cst_12 = arith.constant dense<0.000000e+00> : vector<8x256xf32>
    %18 = tpu.matmul %17, %6, %cst_12 {dimension_numbers = #tpu.dot_dimension_numbers<[1], [0], [0], [1], [0, 0, 1, 1], [], []>} : vector<8x256xbf16>, vector<256x256xbf16>, vector<8x256xf32> -> vector<8x256xf32>
    %19 = vector.broadcast %9 : vector<1x256xf32> to vector<8x256xf32>
    %20 = arith.addf %18, %19 : vector<8x256xf32>
    %cst_13 = arith.constant 0.000000e+00 : f32
    %21 = vector.broadcast %cst_13 : f32 to vector<8x256xf32>
    %22 = arith.maximumf %20, %21 : vector<8x256xf32>
    %23 = arith.truncf %22 : vector<8x256xf32> to vector<8x256xbf16>
    %cst_14 = arith.constant dense<0.000000e+00> : vector<8x256xf32>
    %24 = tpu.matmul %23, %7, %cst_14 {dimension_numbers = #tpu.dot_dimension_numbers<[1], [0], [0], [1], [0, 0, 1, 1], [], []>} : vector<8x256xbf16>, vector<256x256xbf16>, vector<8x256xf32> -> vector<8x256xf32>
    %25 = vector.broadcast %10 : vector<1x256xf32> to vector<8x256xf32>
    %26 = arith.addf %24, %25 : vector<8x256xf32>
    %c0_15 = arith.constant 0 : index
    %c0_16 = arith.constant 0 : index
    %27 = vector.load %arg3[%c0_15, %c0_16] : memref<8x256xf32, #tpu.memory_space<vmem>>, vector<8x256xf32>
    tpu.vector_store %arg3[%c0_15, %c0_16], %26 {strides = array<i32>} : memref<8x256xf32, #tpu.memory_space<vmem>>, vector<8x256xf32>,
    return
  }
}

</mosaic_0001>

<bundles_post_ra>
// kernel: tpu_custom_call.1
= control target key start
LH: loop header
LB: loop body
LE: loop exit
PB: predicated region body
PF: predicated region fallthrough
CT: control target
= control target key end

     0   :  { %8 = vsyncpa [#allocation3], 0  ;;  %s2032_s0 = inlined_call_operand.hbm [shape: f32[8,896], index: 0, kind: input, shape index: {}]   ;;  %s2033_s1 = inlined_call_operand.hbm [shape: bf16[1408,256], index: 1, kind: input, shape index: {}]   ;;  %s2034_s2 = inlined_call_operand.hbm [shape: f32[24,256], index: 2, kind: input, shape index: {}]   ;;  %s2035_s3 = inlined_call_operand.hbm [shape: f32[8,256], index: 3, kind: output, shape index: {}]  }
   0x1   :  { %9 = vsyncpa [#allocation6], 0 }
   0x2   :  { %10 = vsyncpa [#allocation4], 0  ;;  %s1991_s12 = smov [#allocation5]  }
   0x3   :  { %s26_s13 = sshll.u32 %s1991_s12, 4  ;;  %s27_s13 = int_to_ptr.vmem [resolvable:$true] %s26_s13 }
   0x4   :  { %s1913_s14 = scalar_lea.vmem %s27_s13, 22528  ;;  %p1918_p1 = scmp.lt.s32.totalorder %s27_s13, %s27_s13 }
   0x5   :  { %p1914_p0 = scmp.ne.s32.totalorder %s27_s13, %s1913_s14  ;;  %p1919_p2 = scmp.lt.s32.totalorder %s1913_s14, %s1913_s14 }
   0x7   :  { %p1920_p3 = por %p1919_p2, %p1918_p1 }
   0x9   :  { %p1921_p4 = pnand %p1920_p3, %p1914_p0 }
   0xb   :  { %1924 = shalt.err (!%p1921_p4)
}
   0xc   :  { %s1992_s15 = smov 128   ;;  %s1993_s16 = smov 8  }
   0xd   :  { %32 = dma.hbm_to_vmem [thread:$0]  %s2033_s1, 22528, %s27_s13, [#allocation6], %s1992_s15, %s1992_s15, %s1993_s16  }
   0xe   :  { %s1994_s19 = smov [#allocation2]   ;;  %s1995_s21 = smov [#allocation7]  }
   0xf   :  { %s17_s20 = sshll.u32 %s1994_s19, 4  ;;  %s38_s22 = sshll.u32 %s1995_s21, 4  ;;  %s18_s20 = int_to_ptr.vmem [resolvable:$true] %s17_s20  ;;  %s39_s22 = int_to_ptr.vmem [resolvable:$true] %s38_s22 }
  0x10   :  { %s1933_s23 = scalar_lea.vmem %s18_s20, 896  ;;  %p1938_p6 = scmp.lt.s32.totalorder %s18_s20, %s18_s20 }
  0x11   :  { %p1934_p5 = scmp.ne.s32.totalorder %s18_s20, %s1933_s23  ;;  %p1939_p7 = scmp.lt.s32.totalorder %s1933_s23, %s1933_s23 }
  0x13   :  { %p1940_p8 = por %p1939_p7, %p1938_p6 }
  0x15   :  { %p1941_p9 = pnand %p1940_p8, %p1934_p5 }
  0x17   :  { %1944 = shalt.err (!%p1941_p9)
}
  0x18   :  { %20 = dma.hbm_to_vmem [thread:$0]  %s2032_s0, 896, %s18_s20, [#allocation3]  }
  0x19   :  { %s1953_s26 = scalar_lea.vmem %s39_s22, 768  ;;  %p1958_p11 = scmp.lt.s32.totalorder %s39_s22, %s39_s22 }
  0x1a   :  { %p1954_p10 = scmp.ne.s32.totalorder %s39_s22, %s1953_s26  ;;  %p1959_p12 = scmp.lt.s32.totalorder %s1953_s26, %s1953_s26 }
  0x1c   :  { %p1960_p13 = por %p1959_p12, %p1958_p11 }
  0x1e   :  { %p1961_p0 = pnand %p1960_p13, %p1954_p10 }
  0x20   :  { %1964 = shalt.err (!%p1961_p0)
}
  0x21   :  { %s1996_s1 = smov 256   ;;  %s1997_s27 = smov 16  }
  0x22   :  { %44 = dma.hbm_to_vmem [thread:$0]  %s2034_s2, 768, %s39_s22, [#allocation6], %s1996_s1, %s1996_s1, %s1997_s27  }
  0x23   :  { %1985 = dma.done.wait [#allocation3], 896  }
  0x24   :  { %1986 = vsyncadd [#allocation3], 4294966400 }
  0x25   :  { %1987 = dma.done.wait [#allocation6], 23296  }
  0x26   :  { %1988 = vsyncadd [#allocation6], 4294944000  ;;  %v1641_v0 = vld [vmem:[#allocation5 + $0x74] ss:$8 sps:$4 sm:$0xff]   ;;  %v1643_v1 = vld [vmem:[#allocation5 + $0x70] ss:$8 sps:$4 sm:$0xff]  }
  0x27   :  { %835 = vmatprep.subr.bf16.mxu0 %v1641_v0  ;;  %v1644_v2 = vld [vmem:[#allocation5 + $0x174] ss:$8 sps:$4 sm:$0xff]   ;;  %v1646_v3 = vld [vmem:[#allocation5 + $0x170] ss:$8 sps:$4 sm:$0xff]   ;;  %v1647_v4 = vld [vmem:[#allocation5 + $0x64] ss:$8 sps:$4 sm:$0xff]  }
  0x28   :  { %836 = vmatpush1.bf16.msra.mxu0 %v1643_v1  ;;  %v1649_v5 = vld [vmem:[#allocation5 + $0x60] ss:$8 sps:$4 sm:$0xff]   ;;  %876 = vmatprep.subr.bf16.mxu1 %v1644_v2  ;;  %v1650_v6 = vld [vmem:[#allocation5 + $0x164] ss:$8 sps:$4 sm:$0xff]   ;;  %v1653_v8 = vld [vmem:[#allocation5 + $0x54] ss:$8 sps:$4 sm:$0xff]  }
  0x29   :  { %877 = vmatpush1.bf16.msra.mxu1 %v1646_v3  ;;  %837 = vmatprep.subr.bf16.mxu0 %v1647_v4  ;;  %v1652_v7 = vld [vmem:[#allocation5 + $0x160] ss:$8 sps:$4 sm:$0xff]   ;;  %v1655_v9 = vld [vmem:[#allocation5 + $0x50] ss:$8 sps:$4 sm:$0xff]   ;;  %v1656_v10 = vld [vmem:[#allocation5 + $0x154] ss:$8 sps:$4 sm:$0xff]  }
  0x2a   :  { %878 = vmatprep.subr.bf16.mxu1 %v1650_v6  ;;  %v1659_v11 = vld [vmem:[#allocation5 + $0x44] ss:$8 sps:$4 sm:$0xff]   ;;  %v1658_v12 = vld [vmem:[#allocation5 + $0x150] ss:$8 sps:$4 sm:$0xff]   ;;  %v1661_v14 = vld [vmem:[#allocation5 + $0x40] ss:$8 sps:$4 sm:$0xff]  }
  0x2b   :  { %v1662_v13 = vld [vmem:[#allocation5 + $0x144] ss:$8 sps:$4 sm:$0xff]   ;;  %v1665_v15 = vld [vmem:[#allocation5 + $0x34] ss:$8 sps:$4 sm:$0xff]   ;;  %v1664_v16 = vld [vmem:[#allocation5 + $0x140] ss:$8 sps:$4 sm:$0xff]  }
  0x2c   :  { %838 = vmatpush1.bf16.msra.mxu0 %v1649_v5  ;;  %v1668_v17 = vld [vmem:[#allocation5 + $0x134] ss:$8 sps:$4 sm:$0xff]   ;;  %v1667_v18 = vld [vmem:[#allocation5 + $0x30] ss:$8 sps:$4 sm:$0xff]   ;;  %v1671_v19 = vld [vmem:[#allocation5 + $0x24] ss:$8 sps:$4 sm:$0xff]  }
  0x2d   :  { %839 = vmatprep.subr.bf16.mxu0 %v1653_v8  ;;  %879 = vmatpush1.bf16.msra.mxu1 %v1652_v7  ;;  %v1670_v20 = vld [vmem:[#allocation5 + $0x130] ss:$8 sps:$4 sm:$0xff]   ;;  %v1674_v21 = vld [vmem:[#allocation5 + $0x124] ss:$8 sps:$4 sm:$0xff]   ;;  %v1673_v22 = vld [vmem:[#allocation5 + $0x20] ss:$8 sps:$4 sm:$0xff]  }
  0x2e   :  { %880 = vmatprep.subr.bf16.mxu1 %v1656_v10  ;;  %v1677_v23 = vld [vmem:[#allocation5 + $0x14] ss:$8 sps:$4 sm:$0xff]   ;;  %v1676_v24 = vld [vmem:[#allocation5 + $0x120] ss:$8 sps:$4 sm:$0xff]   ;;  %v1679_v26 = vld [vmem:[#allocation5 + $0x10] ss:$8 sps:$4 sm:$0xff]  }
  0x2f   :  { %v1680_v25 = vld [vmem:[#allocation5 + $0x114] ss:$8 sps:$4 sm:$0xff]   ;;  %v1683_v27 = vld [vmem:[#allocation5 + $0x4] ss:$8 sps:$4 sm:$0xff]   ;;  %v1682_v28 = vld [vmem:[#allocation5 + $0x110] ss:$8 sps:$4 sm:$0xff]  }
  0x30   :  { %840 = vmatpush1.bf16.msra.mxu0 %v1655_v9  ;;  %v1686_v29 = vld [vmem:[#allocation5 + $0x104] ss:$8 sps:$4 sm:$0xff]   ;;  %v1685_v30 = vld [vmem:[#allocation5] ss:$8 sps:$4 sm:$0xff]   ;;  %v1689_v31 = vld [vmem:[#allocation5 + $0xf4] ss:$8 sps:$4 sm:$0xff]  }
  0x31   :  { %841 = vmatprep.subr.bf16.mxu0 %v1659_v11  ;;  %881 = vmatpush1.bf16.msra.mxu1 %v1658_v12  ;;  %v1688_v32 = vld [vmem:[#allocation5 + $0x100] ss:$8 sps:$4 sm:$0xff]   ;;  %v1692_v33 = vld [vmem:[#allocation5 + $0x1f4] ss:$8 sps:$4 sm:$0xff]   ;;  %v1691_v34 = vld [vmem:[#allocation5 + $0xf0] ss:$8 sps:$4 sm:$0xff]  }
  0x32   :  { %882 = vmatprep.subr.bf16.mxu1 %v1662_v13  ;;  %v1695_v35 = vld [vmem:[#allocation5 + $0xe4] ss:$8 sps:$4 sm:$0xff]   ;;  %v1694_v36 = vld [vmem:[#allocation5 + $0x1f0] ss:$8 sps:$4 sm:$0xff]   ;;  %v1697_v38 = vld [vmem:[#allocation5 + $0xe0] ss:$8 sps:$4 sm:$0xff]  }
  0x33   :  { %v1698_v37 = vld [vmem:[#allocation5 + $0x1e4] ss:$8 sps:$4 sm:$0xff]   ;;  %v1701_v39 = vld [vmem:[#allocation5 + $0xd4] ss:$8 sps:$4 sm:$0xff]   ;;  %v1700_v40 = vld [vmem:[#allocation5 + $0x1e0] ss:$8 sps:$4 sm:$0xff]  }
  0x34   :  { %842 = vmatpush1.bf16.msra.mxu0 %v1661_v14  ;;  %v1704_v41 = vld [vmem:[#allocation5 + $0x1d4] ss:$8 sps:$4 sm:$0xff]   ;;  %v1703_v42 = vld [vmem:[#allocation5 + $0xd0] ss:$8 sps:$4 sm:$0xff]   ;;  %v1707_v43 = vld [vmem:[#allocation5 + $0xc4] ss:$8 sps:$4 sm:$0xff]  }
  0x35   :  { %843 = vmatprep.subr.bf16.mxu0 %v1665_v15  ;;  %883 = vmatpush1.bf16.msra.mxu1 %v1664_v16  ;;  %v1706_v44 = vld [vmem:[#allocation5 + $0x1d0] ss:$8 sps:$4 sm:$0xff]   ;;  %v1710_v45 = vld [vmem:[#allocation5 + $0x1c4] ss:$8 sps:$4 sm:$0xff]   ;;  %v1709_v47 = vld [vmem:[#allocation5 + $0xc0] ss:$8 sps:$4 sm:$0xff]  }
  0x36   :  { %884 = vmatprep.subr.bf16.mxu1 %v1668_v17  ;;  %v56_v46 = vld [vmem:[#allocation2 + $0x8] sm:$0xff]  ;;  %v1712_v50 = vld [vmem:[#allocation5 + $0x1c0] ss:$8 sps:$4 sm:$0xff]   ;;  %v1719_v57 = vld [vmem:[#allocation5 + $0xa4] ss:$8 sps:$4 sm:$0xff]   ;;  %s1999_s0 = smov [#allocation8]  }
  0x37   :  { %v1450_v48 = vadd.f32 -0.286, %v56_v46  ;;  %v1713_v49 = vld [vmem:[#allocation5 + $0xb4] ss:$8 sps:$4 sm:$0xff]   ;;  %v58_v52 = vld [vmem:[#allocation2 + $0x18] sm:$0xff]  ;;  %v55_v63 = vld [vmem:[#allocation2] sm:$0xff] }
  0x38   :  { %844 = vmatpush1.bf16.msra.mxu0 %v1667_v18  ;;  %v1716_v53 = vld [vmem:[#allocation5 + $0x1b4] ss:$8 sps:$4 sm:$0xff]   ;;  %v1452_v54 = vadd.f32 -0.286, %v58_v52  ;;  %v1715_v55 = vld [vmem:[#allocation5 + $0xb0] ss:$8 sps:$4 sm:$0xff]  }
  0x39   :  { %845 = vmatprep.subr.bf16.mxu0 %v1671_v19  ;;  %885 = vmatpush1.bf16.msra.mxu1 %v1670_v20  ;;  %v70_v51 = vmul.f32 2.8328612, %v1450_v48  ;;  %v1718_v59 = vld [vmem:[#allocation5 + $0x1b0] ss:$8 sps:$4 sm:$0xff]   ;;  %v1721_v60 = vld [vmem:[#allocation5 + $0xa0] ss:$8 sps:$4 sm:$0xff]  }
  0x3a   :  { %886 = vmatprep.subr.bf16.mxu1 %v1674_v21  ;;  %v72_v58 = vmul.f32 2.8328612, %v1452_v54  ;;  %v1722_v61 = vld [vmem:[#allocation5 + $0x1a4] ss:$8 sps:$4 sm:$0xff]   ;;  %v1725_v0 = vld [vmem:[#allocation5 + $0x94] ss:$8 sps:$4 sm:$0xff]  }
  0x3b   :  { %v258_v56 = vpack.c.bf16 %v70_v51, %v70_v51  ;;  %v1724_v1 = vld [vmem:[#allocation5 + $0x1a0] ss:$8 sps:$4 sm:$0xff]   ;;  %v57_v2 = vld [vmem:[#allocation2 + $0x10] sm:$0xff]  ;;  %v1449_v4 = vadd.f32 -0.286, %v55_v63  ;;  %s1439_s2 = sshll.u32 %s1999_s0, 4  ;;  %s1440_s2 = int_to_ptr.vmem [resolvable:$true] %s1439_s2 }
  0x3c   :  { %846 = vmatpush1.bf16.msra.mxu0 %v1673_v22  ;;  %v260_v62 = vpack.c.bf16 %v72_v58, %v72_v58  ;;  %v1728_v3 = vld [vmem:[#allocation5 + $0x194] ss:$8 sps:$4 sm:$0xff]   ;;  %v1727_v5 = vld [vmem:[#allocation5 + $0x90] ss:$8 sps:$4 sm:$0xff]   ;;  %v1731_v6 = vld [vmem:[#allocation5 + $0x84] ss:$8 sps:$4 sm:$0xff]   ;;  %p1970_p2 = scmp.lt.s32.totalorder %s1440_s2, %s1440_s2 }
  0x3d   :  { %847 = vmatprep.subr.bf16.mxu0 %v1677_v23  ;;  %887 = vmatpush1.bf16.msra.mxu1 %v1676_v24  ;;  %v1451_v7 = vadd.f32 -0.286, %v57_v2  ;;  %v1730_v8 = vld [vmem:[#allocation5 + $0x190] ss:$8 sps:$4 sm:$0xff]   ;;  %v1734_v9 = vld [vmem:[#allocation5 + $0x184] ss:$8 sps:$4 sm:$0xff]  }
  0x3e   :  { %888 = vmatprep.subr.bf16.mxu1 %v1680_v25  ;;  %867 = vmatprep.mubr.bf16.mxu0 %v258_v56  ;;  %v69_v10 = vmul.f32 2.8328612, %v1449_v4  ;;  %v1733_v11 = vld [vmem:[#allocation5 + $0x80] ss:$8 sps:$4 sm:$0xff]   ;;  %v1739_v12 = vld [vmem:[#allocation5 + $0x274] ss:$8 sps:$4 sm:$0xff]  }
  0x3f   :  { %908 = vmatprep.mubr.bf16.mxu1 %v260_v62  ;;  %v71_v13 = vmul.f32 2.8328612, %v1451_v7  ;;  %v1736_v14 = vld [vmem:[#allocation5 + $0x180] ss:$8 sps:$4 sm:$0xff]   ;;  %v1763_v16 = vld [vmem:[#allocation5 + $0x374] ss:$8 sps:$4 sm:$0xff]  }
  0x40   :  { %848 = vmatpush1.bf16.msra.mxu0 %v1679_v26  ;;  %v257_v15 = vpack.c.bf16 %v69_v10, %v69_v10  ;;  %v1737_v17 = vld [vmem:[#allocation5 + $0x270] ss:$8 sps:$4 sm:$0xff]   ;;  %v1742_v19 = vld [vmem:[#allocation5 + $0x264] ss:$8 sps:$4 sm:$0xff]   ;;  %v1740_v22 = vld [vmem:[#allocation5 + $0x260] ss:$8 sps:$4 sm:$0xff]  }
  0x41   :  { %849 = vmatprep.subr.bf16.mxu0 %v1683_v27  ;;  %889 = vmatpush1.bf16.msra.mxu1 %v1682_v28  ;;  %v259_v18 = vpack.c.bf16 %v71_v13, %v71_v13  ;;  %v1761_v20 = vld [vmem:[#allocation5 + $0x370] ss:$8 sps:$4 sm:$0xff]   ;;  %v1769_v21 = vld [vmem:[#allocation5 + $0x364] ss:$8 sps:$4 sm:$0xff]   ;;  %v1745_v23 = vld [vmem:[#allocation5 + $0x254] ss:$8 sps:$4 sm:$0xff]  }
  0x42   :  { %890 = vmatprep.subr.bf16.mxu1 %v1686_v29  ;;  %v1767_v24 = vld [vmem:[#allocation5 + $0x360] ss:$8 sps:$4 sm:$0xff]   ;;  %v1998_v25 = vmov 0   ;;  %v1775_v26 = vld [vmem:[#allocation5 + $0x354] ss:$8 sps:$4 sm:$0xff]   ;;  %s1965_s30 = scalar_lea.vmem %s1440_s2, 256 }
  0x43   :  { %v1743_v27 = vld [vmem:[#allocation5 + $0x250] ss:$8 sps:$4 sm:$0xff]   ;;  %v1748_v28 = vld [vmem:[#allocation5 + $0x244] ss:$8 sps:$4 sm:$0xff]   ;;  %v1766_v54 = vld [vmem:[#allocation5 + $0x2f4] ss:$8 sps:$4 sm:$0xff]   ;;  %p1966_p1 = scmp.ne.s32.totalorder %s1440_s2, %s1965_s30  ;;  %p1971_p3 = scmp.lt.s32.totalorder %s1965_s30, %s1965_s30 }
  0x44   :  { %850 = vmatpush1.bf16.msra.mxu0 %v1685_v30  ;;  %v1773_v29 = vld [vmem:[#allocation5 + $0x350] ss:$8 sps:$4 sm:$0xff]   ;;  %v1781_v30 = vld [vmem:[#allocation5 + $0x344] ss:$8 sps:$4 sm:$0xff]   ;;  %v1794_v4 = vld [vmem:[#allocation5 + $0x2a0] ss:$8 sps:$4 sm:$0xff]  }
  0x45   :  { %851 = vmatprep.subr.bf16.mxu0 %v1689_v31  ;;  %891 = vmatpush1.bf16.msra.mxu1 %v1688_v32  ;;  %v1746_v31 = vld [vmem:[#allocation5 + $0x240] ss:$8 sps:$4 sm:$0xff]   ;;  %v1751_v32 = vld [vmem:[#allocation5 + $0x234] ss:$8 sps:$4 sm:$0xff]   ;;  %v1755_v48 = vld [vmem:[#allocation5 + $0x210] ss:$8 sps:$4 sm:$0xff]   ;;  %p1972_p4 = por %p1971_p3, %p1970_p2 }
  0x46   :  { %892 = vmatprep.subr.bf16.mxu1 %v1692_v33  ;;  %v1779_v33 = vld [vmem:[#allocation5 + $0x340] ss:$8 sps:$4 sm:$0xff]   ;;  %v1805_v51 = vld [vmem:[#allocation5 + $0x304] ss:$8 sps:$4 sm:$0xff]   ;;  %v1776_v62 = vld [vmem:[#allocation5 + $0x2d0] ss:$8 sps:$4 sm:$0xff]  }
  0x47   :  { %v1772_v58 = vld [vmem:[#allocation5 + $0x2e4] ss:$8 sps:$4 sm:$0xff]   ;;  %v1788_v2 = vld [vmem:[#allocation5 + $0x2b0] ss:$8 sps:$4 sm:$0xff]   ;;  %p1973_p5 = pnand %p1972_p4, %p1966_p1 }
  0x48   :  { %852 = vmatpush2.bf16.msra.mxu0 %v1691_v34  ;;  %v1787_v34 = vld [vmem:[#allocation5 + $0x334] ss:$8 sps:$4 sm:$0xff]   ;;  %v1784_v63 = vld [vmem:[#allocation5 + $0x2c4] ss:$8 sps:$4 sm:$0xff]   ;;  %v1809_v13 = vld [vmem:[#allocation5 + $0x3f0] ss:$8 sps:$4 sm:$0xff]  }
  0x49   :  { %853 = vmatprep.subr.bf16.mxu0 %v1695_v35  ;;  %893 = vmatpush2.bf16.msra.mxu1 %v1694_v36  ;;  %v60_v35 = vld [vmem:[#allocation2 + $0x28] sm:$0xff] }
  0x4a   :  { %894 = vmatprep.subr.bf16.mxu1 %v1698_v37  ;;  %v1749_v36 = vld [vmem:[#allocation5 + $0x230] ss:$8 sps:$4 sm:$0xff]   ;;  %v1454_v37 = vadd.f32 -0.286, %v60_v35  ;;  %v1844_v35 = vld [vmem:[#allocation5 + $0x444] ss:$8 sps:$4 sm:$0xff]  }
  0x4c   :  { %854 = vmatpush2.bf16.msra.mxu0 %v1697_v38  ;;  %v1754_v38 = vld [vmem:[#allocation5 + $0x224] ss:$8 sps:$4 sm:$0xff]  }
  0x4d   :  { %855 = vmatprep.subr.bf16.mxu0 %v1701_v39  ;;  %895 = vmatpush2.bf16.msra.mxu1 %v1700_v40  ;;  %v1785_v39 = vld [vmem:[#allocation5 + $0x330] ss:$8 sps:$4 sm:$0xff]   ;;  %v1752_v40 = vld [vmem:[#allocation5 + $0x220] ss:$8 sps:$4 sm:$0xff]  }
  0x4e   :  { %896 = vmatprep.subr.bf16.mxu1 %v1704_v41  ;;  %v1793_v41 = vld [vmem:[#allocation5 + $0x324] ss:$8 sps:$4 sm:$0xff]  }
  0x50   :  { %856 = vmatpush2.bf16.msra.mxu0 %v1703_v42  ;;  %v74_v42 = vmul.f32 2.8328612, %v1454_v37  ;;  %v1847_v37 = vld [vmem:[#allocation5 + $0x434] ss:$8 sps:$4 sm:$0xff]  }
  0x51   :  { %857 = vmatprep.subr.bf16.mxu0 %v1707_v43  ;;  %897 = vmatpush2.bf16.msra.mxu1 %v1706_v44  ;;  %v1757_v43 = vld [vmem:[#allocation5 + $0x214] ss:$8 sps:$4 sm:$0xff]   ;;  %v1791_v44 = vld [vmem:[#allocation5 + $0x320] ss:$8 sps:$4 sm:$0xff]  }
  0x52   :  { %898 = vmatprep.subr.bf16.mxu1 %v1710_v45  ;;  %v61_v45 = vld [vmem:[#allocation2 + $0x30] sm:$0xff]  ;;  %v262_v46 = vpack.c.bf16 %v74_v42, %v74_v42 }
  0x53   :  { %v1455_v52 = vadd.f32 -0.286, %v61_v45  ;;  %v1851_v42 = vld [vmem:[#allocation5 + $0x410] ss:$8 sps:$4 sm:$0xff]  }
  0x54   :  { %858 = vmatpush2.bf16.msra.mxu0 %v1709_v47  ;;  %v1799_v47 = vld [vmem:[#allocation5 + $0x314] ss:$8 sps:$4 sm:$0xff]   ;;  %v1857_v45 = vld [vmem:[#allocation5 + $0x4f0] ss:$8 sps:$4 sm:$0xff]  }
  0x55   :  { %859 = vmatprep.subr.bf16.mxu0 %v1713_v49  ;;  %899 = vmatpush2.bf16.msra.mxu1 %v1712_v50  ;;  %v1760_v49 = vld [vmem:[#allocation5 + $0x204] ss:$8 sps:$4 sm:$0xff]   ;;  %v1797_v50 = vld [vmem:[#allocation5 + $0x310] ss:$8 sps:$4 sm:$0xff]   ;;  %v75_v56 = vmul.f32 2.8328612, %v1455_v52 }
  0x56   :  { %900 = vmatprep.subr.bf16.mxu1 %v1716_v53  ;;  %v1758_v53 = vld [vmem:[#allocation5 + $0x200] ss:$8 sps:$4 sm:$0xff]  }
  0x57   :  { %v1866_v52 = vld [vmem:[#allocation5 + $0x4c0] ss:$8 sps:$4 sm:$0xff]  }
  0x58   :  { %860 = vmatpush2.bf16.msra.mxu0 %v1715_v55  ;;  %v1803_v55 = vld [vmem:[#allocation5 + $0x300] ss:$8 sps:$4 sm:$0xff]  }
  0x59   :  { %861 = vmatprep.subr.bf16.mxu0 %v1719_v57  ;;  %901 = vmatpush2.bf16.msra.mxu1 %v1718_v59  ;;  %v1764_v57 = vld [vmem:[#allocation5 + $0x2f0] ss:$8 sps:$4 sm:$0xff]   ;;  %v263_v59 = vpack.c.bf16 %v75_v56, %v75_v56  ;;  %v1872_v56 = vld [vmem:[#allocation5 + $0x4a0] ss:$8 sps:$4 sm:$0xff]  }
  0x5a   :  { %902 = vmatprep.subr.bf16.mxu1 %v1722_v61  ;;  %v1778_v61 = vld [vmem:[#allocation5 + $0x2d4] ss:$8 sps:$4 sm:$0xff]  }
  0x5c   :  { %862 = vmatpush2.bf16.msra.mxu0 %v1721_v60  ;;  %v1770_v60 = vld [vmem:[#allocation5 + $0x2e0] ss:$8 sps:$4 sm:$0xff]  }
  0x5d   :  { %863 = vmatprep.subr.bf16.mxu0 %v1725_v0  ;;  %903 = vmatpush2.bf16.msra.mxu1 %v1724_v1  ;;  %v1782_v0 = vld [vmem:[#allocation5 + $0x2c0] ss:$8 sps:$4 sm:$0xff]   ;;  %v1790_v1 = vld [vmem:[#allocation5 + $0x2b4] ss:$8 sps:$4 sm:$0xff]  }
  0x5e   :  { %904 = vmatprep.subr.bf16.mxu1 %v1728_v3  ;;  %v1796_v3 = vld [vmem:[#allocation5 + $0x2a4] ss:$8 sps:$4 sm:$0xff]  }
  0x60   :  { %864 = vmatpush2.bf16.msra.mxu0 %v1727_v5  ;;  %v59_v5 = vld [vmem:[#allocation2 + $0x20] sm:$0xff] }
  0x61   :  { %865 = vmatprep.subr.bf16.mxu0 %v1731_v6  ;;  %905 = vmatpush2.bf16.msra.mxu1 %v1730_v8  ;;  %v1802_v6 = vld [vmem:[#allocation5 + $0x294] ss:$8 sps:$4 sm:$0xff]   ;;  %v1453_v7 = vadd.f32 -0.286, %v59_v5  ;;  %v1800_v8 = vld [vmem:[#allocation5 + $0x290] ss:$8 sps:$4 sm:$0xff]  }
  0x62   :  { %906 = vmatprep.subr.bf16.mxu1 %v1734_v9  ;;  %v1808_v9 = vld [vmem:[#allocation5 + $0x284] ss:$8 sps:$4 sm:$0xff]   ;;  %v1895_v5 = vld [vmem:[#allocation5 + $0x534] ss:$8 sps:$4 sm:$0xff]  }
  0x63   :  { %v73_v10 = vmul.f32 2.8328612, %v1453_v7  ;;  %v1898_v7 = vld [vmem:[#allocation5 + $0x524] ss:$8 sps:$4 sm:$0xff]  }
  0x64   :  { %866 = vmatpush2.bf16.msra.mxu0 %v1733_v11  ;;  %v1806_v11 = vld [vmem:[#allocation5 + $0x280] ss:$8 sps:$4 sm:$0xff]  }
  0x65   :  { %917 = vmatprep.subr.bf16.mxu0 %v1739_v12  ;;  %907 = vmatpush2.bf16.msra.mxu1 %v1736_v14  ;;  %v261_v12 = vpack.c.bf16 %v73_v10, %v73_v10  ;;  %v1811_v14 = vld [vmem:[#allocation5 + $0x3f4] ss:$8 sps:$4 sm:$0xff]  }
  0x66   :  { %958 = vmatprep.subr.bf16.mxu1 %v1763_v16  ;;  %v1812_v16 = vld [vmem:[#allocation5 + $0x3e0] ss:$8 sps:$4 sm:$0xff]  }
  0x67   :  { %868 = vmatmul.mubr.bf16.vlgmr.msra.gmra.mxu0 %v257_v15  ;;  %v1814_v15 = vld [vmem:[#allocation5 + $0x3e4] ss:$8 sps:$4 sm:$0xff]  }
  0x68   :  { %918 = vmatpush1.bf16.msra.mxu0 %v1737_v17  ;;  %909 = vmatmul.mubr.bf16.vlgmr.msra.gmra.mxu1 %v259_v18  ;;  %v1817_v17 = vld [vmem:[#allocation5 + $0x3d4] ss:$8 sps:$4 sm:$0xff]   ;;  %v1815_v18 = vld [vmem:[#allocation5 + $0x3d0] ss:$8 sps:$4 sm:$0xff]  }
  0x69   :  { %919 = vmatprep.subr.bf16.mxu0 %v1742_v19  ;;  %959 = vmatpush1.bf16.msra.mxu1 %v1761_v20  ;;  %v1820_v19 = vld [vmem:[#allocation5 + $0x3c4] ss:$8 sps:$4 sm:$0xff]   ;;  %v1818_v20 = vld [vmem:[#allocation5 + $0x3c0] ss:$8 sps:$4 sm:$0xff]  }
  0x6a   :  { %990 = vmatprep.mubr.bf16.mxu1 %v1998_v25  ;;  %960 = vmatprep.subr.bf16.mxu1 %v1769_v21  ;;  %v1823_v21 = vld [vmem:[#allocation5 + $0x3b4] ss:$8 sps:$4 sm:$0xff]  }
  0x6b   :  { %949 = vmatprep.mubr.bf16.mxu0 %v262_v46  ;;  %v1829_v25 = vld [vmem:[#allocation5 + $0x394] ss:$8 sps:$4 sm:$0xff]  }
  0x6c   :  { %920 = vmatpush1.bf16.msra.mxu0 %v1740_v22  ;;  %v1821_v22 = vld [vmem:[#allocation5 + $0x3b0] ss:$8 sps:$4 sm:$0xff]   ;;  %v1859_v46 = vld [vmem:[#allocation5 + $0x4f4] ss:$8 sps:$4 sm:$0xff]  }
  0x6d   :  { %921 = vmatprep.subr.bf16.mxu0 %v1745_v23  ;;  %961 = vmatpush1.bf16.msra.mxu1 %v1767_v24  ;;  %v1826_v23 = vld [vmem:[#allocation5 + $0x3a4] ss:$8 sps:$4 sm:$0xff]   ;;  %v1824_v24 = vld [vmem:[#allocation5 + $0x3a0] ss:$8 sps:$4 sm:$0xff]  }
  0x6e   :  { %962 = vmatprep.subr.bf16.mxu1 %v1775_v26  ;;  %v1827_v26 = vld [vmem:[#allocation5 + $0x390] ss:$8 sps:$4 sm:$0xff]  }
  0x70   :  { %922 = vmatpush1.bf16.msra.mxu0 %v1743_v27  ;;  %v1832_v27 = vld [vmem:[#allocation5 + $0x384] ss:$8 sps:$4 sm:$0xff]  }
  0x71   :  { %923 = vmatprep.subr.bf16.mxu0 %v1748_v28  ;;  %963 = vmatpush1.bf16.msra.mxu1 %v1773_v29  ;;  %v1830_v28 = vld [vmem:[#allocation5 + $0x380] ss:$8 sps:$4 sm:$0xff]   ;;  %v1835_v29 = vld [vmem:[#allocation5 + $0x474] ss:$8 sps:$4 sm:$0xff]  }
  0x72   :  { %964 = vmatprep.subr.bf16.mxu1 %v1781_v30  ;;  %v1833_v30 = vld [vmem:[#allocation5 + $0x470] ss:$8 sps:$4 sm:$0xff]  }
  0x74   :  { %924 = vmatpush1.bf16.msra.mxu0 %v1746_v31  ;;  %v1838_v31 = vld [vmem:[#allocation5 + $0x464] ss:$8 sps:$4 sm:$0xff]  }
  0x75   :  { %925 = vmatprep.subr.bf16.mxu0 %v1751_v32  ;;  %965 = vmatpush1.bf16.msra.mxu1 %v1779_v33  ;;  %v1836_v32 = vld [vmem:[#allocation5 + $0x460] ss:$8 sps:$4 sm:$0xff]   ;;  %v1841_v33 = vld [vmem:[#allocation5 + $0x454] ss:$8 sps:$4 sm:$0xff]  }
  0x76   :  { %966 = vmatprep.subr.bf16.mxu1 %v1787_v34  ;;  %v1839_v34 = vld [vmem:[#allocation5 + $0x450] ss:$8 sps:$4 sm:$0xff]  }
  0x78   :  { %926 = vmatpush1.bf16.msra.mxu0 %v1749_v36  ;;  %v1842_v36 = vld [vmem:[#allocation5 + $0x440] ss:$8 sps:$4 sm:$0xff]  }
  0x79   :  { %927 = vmatprep.subr.bf16.mxu0 %v1754_v38  ;;  %967 = vmatpush1.bf16.msra.mxu1 %v1785_v39  ;;  %v1845_v38 = vld [vmem:[#allocation5 + $0x430] ss:$8 sps:$4 sm:$0xff]   ;;  %v1850_v39 = vld [vmem:[#allocation5 + $0x424] ss:$8 sps:$4 sm:$0xff]  }
  0x7a   :  { %968 = vmatprep.subr.bf16.mxu1 %v1793_v41  ;;  %v1853_v41 = vld [vmem:[#allocation5 + $0x414] ss:$8 sps:$4 sm:$0xff]  }
  0x7c   :  { %928 = vmatpush1.bf16.msra.mxu0 %v1752_v40  ;;  %v1848_v40 = vld [vmem:[#allocation5 + $0x420] ss:$8 sps:$4 sm:$0xff]  }
  0x7d   :  { %929 = vmatprep.subr.bf16.mxu0 %v1757_v43  ;;  %969 = vmatpush1.bf16.msra.mxu1 %v1791_v44  ;;  %v1856_v43 = vld [vmem:[#allocation5 + $0x404] ss:$8 sps:$4 sm:$0xff]   ;;  %v1854_v44 = vld [vmem:[#allocation5 + $0x400] ss:$8 sps:$4 sm:$0xff]  }
  0x7e   :  { %970 = vmatprep.subr.bf16.mxu1 %v1799_v47  ;;  %v1862_v47 = vld [vmem:[#allocation5 + $0x4e4] ss:$8 sps:$4 sm:$0xff]  }
  0x80   :  { %930 = vmatpush1.bf16.msra.mxu0 %v1755_v48  ;;  %v1860_v48 = vld [vmem:[#allocation5 + $0x4e0] ss:$8 sps:$4 sm:$0xff]  }
  0x81   :  { %931 = vmatprep.subr.bf16.mxu0 %v1760_v49  ;;  %971 = vmatpush1.bf16.msra.mxu1 %v1797_v50  ;;  %v1865_v49 = vld [vmem:[#allocation5 + $0x4d4] ss:$8 sps:$4 sm:$0xff]   ;;  %v1863_v50 = vld [vmem:[#allocation5 + $0x4d0] ss:$8 sps:$4 sm:$0xff]  }
  0x82   :  { %972 = vmatprep.subr.bf16.mxu1 %v1805_v51  ;;  %v1868_v51 = vld [vmem:[#allocation5 + $0x4c4] ss:$8 sps:$4 sm:$0xff]  }
  0x84   :  { %932 = vmatpush1.bf16.msra.mxu0 %v1758_v53  ;;  %v1871_v53 = vld [vmem:[#allocation5 + $0x4b4] ss:$8 sps:$4 sm:$0xff]  }
  0x85   :  { %933 = vmatprep.subr.bf16.mxu0 %v1766_v54  ;;  %973 = vmatpush1.bf16.msra.mxu1 %v1803_v55  ;;  %v1869_v54 = vld [vmem:[#allocation5 + $0x4b0] ss:$8 sps:$4 sm:$0xff]   ;;  %v1874_v55 = vld [vmem:[#allocation5 + $0x4a4] ss:$8 sps:$4 sm:$0xff]  }
  0x86   :  { %1174 = vmatprep.subr.bf16.mxu1 %v1811_v14 }
  0x88   :  { %934 = vmatpush2.bf16.msra.mxu0 %v1764_v57  ;;  %991 = vmatmul.mubr.bf16.vlgmr.msra.gmra.mxu1 %v263_v59  ;;  %v1877_v57 = vld [vmem:[#allocation5 + $0x494] ss:$8 sps:$4 sm:$0xff]   ;;  %v1880_v59 = vld [vmem:[#allocation5 + $0x484] ss:$8 sps:$4 sm:$0xff]  }
  0x89   :  { %935 = vmatprep.subr.bf16.mxu0 %v1772_v58  ;;  %1175 = vmatpush1.bf16.msra.mxu1 %v1809_v13  ;;  %v1875_v58 = vld [vmem:[#allocation5 + $0x490] ss:$8 sps:$4 sm:$0xff]  }
  0x8a   :  { %1176 = vmatprep.subr.bf16.mxu1 %v1814_v15 }
  0x8c   :  { %936 = vmatpush2.bf16.msra.mxu0 %v1770_v60  ;;  %v1878_v60 = vld [vmem:[#allocation5 + $0x480] ss:$8 sps:$4 sm:$0xff]  }
  0x8d   :  { %937 = vmatprep.subr.bf16.mxu0 %v1778_v61  ;;  %1177 = vmatpush1.bf16.msra.mxu1 %v1812_v16  ;;  %v1883_v61 = vld [vmem:[#allocation5 + $0x574] ss:$8 sps:$4 sm:$0xff]  }
  0x8e   :  { %1178 = vmatprep.subr.bf16.mxu1 %v1817_v17 }
  0x90   :  { %938 = vmatpush2.bf16.msra.mxu0 %v1776_v62  ;;  %v1881_v62 = vld [vmem:[#allocation5 + $0x570] ss:$8 sps:$4 sm:$0xff]  }
  0x91   :  { %939 = vmatprep.subr.bf16.mxu0 %v1784_v63  ;;  %1179 = vmatpush1.bf16.msra.mxu1 %v1815_v18  ;;  %v1886_v63 = vld [vmem:[#allocation5 + $0x564] ss:$8 sps:$4 sm:$0xff]  }
  0x92   :  { %1180 = vmatprep.subr.bf16.mxu1 %v1820_v19 }
  0x94   :  { %940 = vmatpush2.bf16.msra.mxu0 %v1782_v0  ;;  %v1884_v0 = vld [vmem:[#allocation5 + $0x560] ss:$8 sps:$4 sm:$0xff]  }
  0x95   :  { %941 = vmatprep.subr.bf16.mxu0 %v1790_v1  ;;  %1181 = vmatpush1.bf16.msra.mxu1 %v1818_v20  ;;  %v1889_v1 = vld [vmem:[#allocation5 + $0x554] ss:$8 sps:$4 sm:$0xff]  }
  0x96   :  { %1182 = vmatprep.subr.bf16.mxu1 %v1823_v21  ;;  %v265_v21 = vlaneseq }
  0x98   :  { %942 = vmatpush2.bf16.msra.mxu0 %v1788_v2  ;;  %v1887_v2 = vld [vmem:[#allocation5 + $0x550] ss:$8 sps:$4 sm:$0xff]  }
  0x99   :  { %943 = vmatprep.subr.bf16.mxu0 %v1796_v3  ;;  %1183 = vmatpush1.bf16.msra.mxu1 %v1821_v22  ;;  %v1892_v3 = vld [vmem:[#allocation5 + $0x544] ss:$8 sps:$4 sm:$0xff]   ;;  %v266_v22 = vshrl.u32 %v265_v21, 7 }
  0x9a   :  { %1184 = vmatprep.subr.bf16.mxu1 %v1826_v23 }
  0x9b   :  { %v267_v23 = vsub.s32 0, %v266_v22 }
  0x9c   :  { %944 = vmatpush2.bf16.msra.mxu0 %v1794_v4  ;;  %v1890_v4 = vld [vmem:[#allocation5 + $0x540] ss:$8 sps:$4 sm:$0xff]  }
  0x9d   :  { %945 = vmatprep.subr.bf16.mxu0 %v1802_v6  ;;  %1185 = vmatpush1.bf16.msra.mxu1 %v1824_v24  ;;  %v1893_v6 = vld [vmem:[#allocation5 + $0x530] ss:$8 sps:$4 sm:$0xff]   ;;  %v252_v24 = vld [vmem:[#allocation7] ss:$8 sm:$0x3] }
  0x9e   :  { %1186 = vmatprep.subr.bf16.mxu1 %v1829_v25  ;;  %v271_v25 = vsub.s32 1, %v266_v22 }
  0xa0   :  { %946 = vmatpush2.bf16.msra.mxu0 %v1800_v8  ;;  %v1896_v8 = vld [vmem:[#allocation5 + $0x520] ss:$8 sps:$4 sm:$0xff]  }
  0xa1   :  { %947 = vmatprep.subr.bf16.mxu0 %v1808_v9  ;;  %1187 = vmatpush1.bf16.msra.mxu1 %v1827_v26  ;;  %v268_v26 = vrot.slane %v252_v24, %v267_v23 }
  0xa2   :  { %1188 = vmatprep.subr.bf16.mxu1 %v1832_v27  ;;  %v272_v27 = vrot.slane %v252_v24, %v271_v25 }
  0xa4   :  { %948 = vmatpush2.bf16.msra.mxu0 %v1806_v11 }
  0xa5   :  { %1189 = vmatpush1.bf16.msra.mxu1 %v1830_v28  ;;  %1390 = vmatprep.subr.bf16.mxu0 %v1859_v46  ;;  %v1904_v46 = vld [vmem:[#allocation5 + $0x504] ss:$8 sps:$4 sm:$0xff]  }
  0xa6   :  { %1190 = vmatprep.subr.bf16.mxu1 %v1835_v29 }
  0xa7   :  { %950 = vmatmul.mubr.bf16.vlgmr.msra.gmra.mxu0 %v261_v12 }
  0xa8   :  { %1391 = vmatpush1.bf16.msra.mxu0 %v1857_v45  ;;  %v1899_v45 = vld [vmem:[#allocation5 + $0x510] ss:$8 sps:$4 sm:$0xff]  }
  0xa9   :  { %1191 = vmatpush2.bf16.msra.mxu1 %v1833_v30  ;;  %1392 = vmatprep.subr.bf16.mxu0 %v1862_v47  ;;  %v1902_v47 = vld [vmem:[#allocation5 + $0x500] ss:$8 sps:$4 sm:$0xff]  }
  0xaa   :  { %1192 = vmatprep.subr.bf16.mxu1 %v1838_v31 }
  0xac   :  { %1393 = vmatpush1.bf16.msra.mxu0 %v1860_v48  ;;  %v254_v48 = vld [vmem:[#allocation7 + $0x10] ss:$8 sm:$0x3] }
  0xad   :  { %1193 = vmatpush2.bf16.msra.mxu1 %v1836_v32  ;;  %1394 = vmatprep.subr.bf16.mxu0 %v1865_v49  ;;  %v1007_v49 = vrot.slane %v254_v48, %v267_v23 }
  0xae   :  { %1194 = vmatprep.subr.bf16.mxu1 %v1841_v33 }
  0xb0   :  { %1395 = vmatpush1.bf16.msra.mxu0 %v1863_v50  ;;  %v1011_v50 = vrot.slane %v254_v48, %v271_v25 }
  0xb1   :  { %1195 = vmatpush2.bf16.msra.mxu1 %v1839_v34  ;;  %1396 = vmatprep.subr.bf16.mxu0 %v1868_v51 }
  0xb2   :  { %1196 = vmatprep.subr.bf16.mxu1 %v1844_v35 }
  0xb4   :  { %1397 = vmatpush1.bf16.msra.mxu0 %v1866_v52 }
  0xb5   :  { %1197 = vmatpush2.bf16.msra.mxu1 %v1842_v36  ;;  %1398 = vmatprep.subr.bf16.mxu0 %v1871_v53 }
  0xb6   :  { %1198 = vmatprep.subr.bf16.mxu1 %v1847_v37 }
  0xb8   :  { %1399 = vmatpush1.bf16.msra.mxu0 %v1869_v54 }
  0xb9   :  { %1199 = vmatpush2.bf16.msra.mxu1 %v1845_v38  ;;  %1400 = vmatprep.subr.bf16.mxu0 %v1874_v55 }
  0xba   :  { %1200 = vmatprep.subr.bf16.mxu1 %v1850_v39 }
  0xbc   :  { %1401 = vmatpush1.bf16.msra.mxu0 %v1872_v56 }
  0xbd   :  { %1201 = vmatpush2.bf16.msra.mxu1 %v1848_v40  ;;  %1402 = vmatprep.subr.bf16.mxu0 %v1877_v57 }
  0xbe   :  { %1202 = vmatprep.subr.bf16.mxu1 %v1853_v41 }
  0xc0   :  { %1403 = vmatpush1.bf16.msra.mxu0 %v1875_v58 }
  0xc1   :  { %1203 = vmatpush2.bf16.msra.mxu1 %v1851_v42  ;;  %1404 = vmatprep.subr.bf16.mxu0 %v1880_v59 }
  0xc2   :  { %1204 = vmatprep.subr.bf16.mxu1 %v1856_v43 }
  0xc4   :  { %1405 = vmatpush1.bf16.msra.mxu0 %v1878_v60 }
  0xc5   :  { %1205 = vmatpush2.bf16.msra.mxu1 %v1854_v44  ;;  %1406 = vmatprep.subr.bf16.mxu0 %v1883_v61  ;;  %v1901_v44 = vld [vmem:[#allocation5 + $0x514] ss:$8 sps:$4 sm:$0xff]   ;;  %v256_v61 = vld [vmem:[#allocation7 + $0x20] ss:$8 sm:$0x3] }
  0xc8   :  { %1407 = vmatpush2.bf16.msra.mxu0 %v1881_v62  ;;  %v1223_v62 = vrot.slane %v256_v61, %v267_v23 }
  0xc9   :  { %1408 = vmatprep.subr.bf16.mxu0 %v1886_v63  ;;  %v1227_v63 = vrot.slane %v256_v61, %v271_v25 }
  0xcc   :  { %1409 = vmatpush2.bf16.msra.mxu0 %v1884_v0 }
  0xcd   :  { %1410 = vmatprep.subr.bf16.mxu0 %v1889_v1 }
  0xd0   :  { %1411 = vmatpush2.bf16.msra.mxu0 %v1887_v2 }
  0xd1   :  { %1412 = vmatprep.subr.bf16.mxu0 %v1892_v3 }
  0xd4   :  { %1413 = vmatpush2.bf16.msra.mxu0 %v1890_v4 }
  0xd5   :  { %1414 = vmatprep.subr.bf16.mxu0 %v1895_v5 }
  0xd8   :  { %1415 = vmatpush2.bf16.msra.mxu0 %v1893_v6 }
  0xd9   :  { %1416 = vmatprep.subr.bf16.mxu0 %v1898_v7 }
  0xdc   :  { %1417 = vmatpush2.bf16.msra.mxu0 %v1896_v8 }
  0xdd   :  { %1418 = vmatprep.subr.bf16.mxu0 %v1901_v44 }
  0xe0   :  { %1419 = vmatpush2.bf16.msra.mxu0 %v1899_v45 }
  0xe1   :  { %1420 = vmatprep.subr.bf16.mxu0 %v1904_v46 }
  0xe4   :  { %1421 = vmatpush2.bf16.msra.mxu0 %v1902_v47 }
 0x127   :  { %v869_v9 = vpop.f32.mrf.mxu0 }
 0x128   :  { %v910_v11 = vpop.f32.mrf.mxu1  ;;  %v870_v28 = vadd.f32 %v869_v9, %v268_v26 }
 0x129   :  { %v871_v10 = vpop.f32.mrf.mxu0 }
 0x12a   :  { %v912_v13 = vpop.f32.mrf.mxu1  ;;  %v872_v29 = vadd.f32 %v871_v10, %v272_v27  ;;  %v911_v30 = vadd.f32 %v910_v11, %v870_v28 }
 0x12b   :  { %v873_v12 = vpop.f32.mrf.mxu0 }
 0x12c   :  { %v914_v15 = vpop.f32.mrf.mxu1  ;;  %v913_v32 = vadd.f32 %v912_v13, %v872_v29 }
 0x12d   :  { %v874_v14 = vpop.f32.mrf.mxu0 }
 0x12e   :  { %v915_v16 = vpop.f32.mrf.mxu1 }
 0x148   :  { %v992_v17 = vpop.f32.mrf.mxu1 }
 0x14a   :  { %v994_v18 = vpop.f32.mrf.mxu1 }
 0x14c   :  { %v996_v19 = vpop.f32.mrf.mxu1 }
 0x14e   :  { %v997_v20 = vpop.f32.mrf.mxu1 }
 0x167   :  { %v951_v31 = vpop.f32.mrf.mxu0 }
 0x168   :  { %v952_v33 = vadd.f32 %v951_v31, %v911_v30 }
 0x169   :  { %v953_v34 = vpop.f32.mrf.mxu0 }
 0x16a   :  { %v993_v35 = vadd.f32 %v992_v17, %v952_v33  ;;  %v954_v36 = vadd.f32 %v953_v34, %v913_v32 }
 0x16b   :  { %v955_v37 = vpop.f32.mrf.mxu0 }
 0x16c   :  { %v995_v38 = vadd.f32 %v994_v18, %v954_v36  ;;  %v999_v39 = vmax.f32 %v993_v35, 0.0 }
 0x16d   :  { %v956_v40 = vpop.f32.mrf.mxu0 }
 0x16e   :  { %v1000_v41 = vmax.f32 %v995_v38, 0.0  ;;  %v1001_v43 = vpack.c.bf16 %v999_v39, %v999_v39 }
 0x170   :  { %v1002_v42 = vpack.c.bf16 %v1000_v41, %v1000_v41 }
 0x172   :  { %1206 = vmatprep.mubr.bf16.mxu1 %v1002_v42 }
 0x173   :  { %1207 = vmatmul.mubr.bf16.vlgmr.msra.gmra.mxu1 %v1001_v43 }
 0x233   :  { %v1208_v51 = vpop.f32.mrf.mxu1 }
 0x234   :  { %v1209_v52 = vadd.f32 %v1208_v51, %v1007_v49 }
 0x235   :  { %v1210_v53 = vpop.f32.mrf.mxu1 }
 0x236   :  { %v1211_v54 = vadd.f32 %v1210_v53, %v1011_v50  ;;  %v1215_v55 = vmax.f32 %v1209_v52, 0.0 }
 0x237   :  { %v1212_v56 = vpop.f32.mrf.mxu1 }
 0x238   :  { %v1216_v57 = vmax.f32 %v1211_v54, 0.0  ;;  %v1217_v60 = vpack.c.bf16 %v1215_v55, %v1215_v55 }
 0x239   :  { %v1213_v58 = vpop.f32.mrf.mxu1 }
 0x23a   :  { %v1218_v59 = vpack.c.bf16 %v1216_v57, %v1216_v57 }
 0x23c   :  { %1422 = vmatprep.mubr.bf16.mxu0 %v1218_v59 }
 0x23d   :  { %1423 = vmatmul.mubr.bf16.vlgmr.msra.gmra.mxu0 %v1217_v60 }
 0x2fd   :  { %v1424_v0 = vpop.f32.mrf.mxu0 }
 0x2fe   :  { %v1425_v1 = vadd.f32 %v1424_v0, %v1223_v62 }
 0x2ff   :  { %v1426_v2 = vpop.f32.mrf.mxu0 }
 0x300   :  { %1431 = vst [vmem:[#allocation8] sm:$0xff] %v1425_v1  ;;  %v1427_v3 = vadd.f32 %v1426_v2, %v1227_v63 }
 0x301   :  { %v1428_v4 = vpop.f32.mrf.mxu0 }
 0x302   :  { %1432 = vst [vmem:[#allocation8 + $0x8] sm:$0xff] %v1427_v3 }
 0x303   :  { %v1429_v5 = vpop.f32.mrf.mxu0 }
 0x304   :  { %1976 = shalt.err (!%p1973_p5)
}
 0x305   :  { %1442 = dma.vmem_to_hbm [thread:$0]  %s1440_s2, 256, %s2035_s3, [#allocation4]  }
 0x306   :  { %1989 = dma.done.wait [#allocation4], 256  }
 0x307   :  { %1990 = vsyncadd [#allocation4], 4294967040 }
 0x308   :  { %1446 = vsyncpa [#allocation3], 1 }
 0x309   :  { %1447 = vsyncpa [#allocation6], 1 }
 0x30a   :  { %1448 = vsyncpa [#allocation4], 1 }

</bundles_post_ra>
